<compile_context>
chip_gen: v7x
topology: tpu7x:2x2x1
jax: 0.10.0
libtpu: 0.0.40
codegen_flags: <defaults>
</compile_context>

<pallas_src>
import functools

import jax
import jax.numpy as jnp
from jax.experimental import pallas as pl
from jax.experimental.pallas import tpu as pltpu


def attention_kernel(x_ref, gamma_ref, beta_ref, wqkv_ref, wout_ref, bout_ref,
                     o_ref, *, heads, dim_head, eps, compute_dtype):
    if compute_dtype is None:
        cast = lambda t: t
    else:
        cast = lambda t: t.astype(compute_dtype)

    bt, n, d = x_ref.shape
    inner = heads * dim_head

    # ---- LayerNorm over features (f32, biased variance, torch eps) ----
    x = x_ref[...]                                             # (bt, n, d)
    mean = jnp.mean(x, axis=-1, keepdims=True)
    var = jnp.mean((x - mean) ** 2, axis=-1, keepdims=True)
    xn = (x - mean) * jax.lax.rsqrt(var + eps) * gamma_ref[...] + beta_ref[...]

    # ---- QKV projection: single lane-dense 2-D matmul ----
    xn2 = xn.reshape(bt * n, d)                                # leading merge
    qkv = jnp.dot(cast(xn2), cast(wqkv_ref[...]),
                  preferred_element_type=jnp.float32)          # (bt*n, 3*inner)
    qkv = qkv.reshape(bt, n, 3 * inner)                        # leading split

    # layout-only split into (G = bt*heads, n, dh) per chunk (q / k / v);
    # static lane slices + stack + leading-dim reshape -- no matmuls, no copies
    # of xn, no per-head MXU pushes.
    def heads_of(chunk):
        cols = [qkv[:, :, (chunk * heads + h) * dim_head:
                          (chunk * heads + h + 1) * dim_head]
                for h in range(heads)]                         # each (bt,n,dh)
        return jnp.stack(cols, axis=1).reshape(bt * heads, n, dim_head)

    q = heads_of(0)          # scale already folded into q-weight columns
    k = heads_of(1)
    v = heads_of(2)

    # ---- scores + softmax (f32); normalization folded after PV matmul ----
    dots = jnp.einsum("gqd,gkd->gqk", cast(q), cast(k),
                      preferred_element_type=jnp.float32)      # (G, n, n)
    m = jnp.max(dots, axis=-1, keepdims=True)
    p = jnp.exp(dots - m)
    l = jnp.sum(p, axis=-1, keepdims=True)
    out = jnp.einsum("gqk,gkd->gqd", cast(p), cast(v),
                     preferred_element_type=jnp.float32)       # (G, n, dh)
    out = out * pl.reciprocal(l, approx=True)                  # dropout(p=0)=id

    # ---- fused output projection: one matmul contracting inner = heads*dh ----
    out = out.reshape(bt, heads, n, dim_head)                  # leading split
    out_flat = jnp.concatenate([out[:, h] for h in range(heads)],
                               axis=-1).reshape(bt * n, inner) # (bt*n, inner)
    y = jnp.dot(cast(out_flat), cast(wout_ref[...]),
                preferred_element_type=jnp.float32)            # (bt*n, Dp)
    y = y + bout_ref[...]
    o_ref[...] = y.reshape(bt, n, o_ref.shape[-1]).astype(o_ref.dtype)


def prepare_attention_params(gamma, beta, w_qkv, w_out, b_out, *, heads,
                             dim_head):
    """One-time parameter prep: fold q-scale into w_qkv, pad output lanes.

    Call once at setup (layout plumbing), not per forward pass.
    """
    D = gamma.shape[0]
    inner = heads * dim_head
    assert w_qkv.shape == (D, 3 * inner) and w_out.shape == (inner, D)
    scale = dim_head ** (-0.5)

    w_qkv_s = w_qkv.at[:, :inner].multiply(scale)        # fold q scaling
    Dp = pl.cdiv(D, 128) * 128                            # lane-dense stores
    if Dp != D:
        w_out_p = jnp.pad(w_out, ((0, 0), (0, Dp - D)))
        b_out_p = jnp.pad(b_out.reshape(-1), (0, Dp - D)).reshape(1, Dp)
    else:
        w_out_p = w_out
        b_out_p = b_out.reshape(1, Dp)

    return dict(gamma=gamma.reshape(1, D), beta=beta.reshape(1, D),
                w_qkv=w_qkv_s, w_out=w_out_p, b_out=b_out_p,
                heads=heads, dim_head=dim_head, dim=D, dim_padded=Dp)


def attention_forward(x, params, *, compute_dtype=jnp.bfloat16,
                      block_batch=None):
    B, N, D = x.shape
    heads = params["heads"]
    dim_head = params["dim_head"]
    inner = heads * dim_head
    Dp = params["dim_padded"]
    assert D == params["dim"]

    # >=2 equal "parallel" grid steps when possible (uses both v7x TCs) while
    # amortizing per-step overhead over block_batch*N rows.
    if block_batch is None:
        block_batch = B // 2 if (B >= 2 and B % 2 == 0) else B
    assert B % block_batch == 0
    grid = (B // block_batch,)

    kern = functools.partial(attention_kernel, heads=heads, dim_head=dim_head,
                             eps=1e-5, compute_dtype=compute_dtype)

    # Rough live-VMEM estimate; only raise the scoped limit when the default
    # (32 MiB) would not fit (v7x has 64 MiB physical VMEM per TC).
    bt = block_batch
    est_bytes = 4 * (2 * bt * N * D                  # x block (double buffered)
                     + 2 * bt * N * Dp               # out block (double buffered)
                     + 2 * (D * 3 * inner + inner * Dp + 2 * D + Dp)  # weights
                     + bt * N * 3 * inner            # qkv
                     + 3 * heads * bt * N * dim_head  # q, k, v
                     + 3 * heads * bt * N * N        # dots, p + slack
                     + bt * N * inner + bt * N * Dp)  # out_flat, y
    cp_kwargs = dict(dimension_semantics=("parallel",))
    if est_bytes > (32 << 20):
        cp_kwargs["vmem_limit_bytes"] = min(int(est_bytes * 1.25), 64 << 20)

    out = pl.pallas_call(
        kern,
        out_shape=jax.ShapeDtypeStruct((B, N, Dp), x.dtype),
        grid=grid,
        in_specs=[
            pl.BlockSpec((block_batch, N, D), lambda b: (b, 0, 0)),   # x
            pl.BlockSpec((1, D), lambda b: (0, 0)),                   # gamma
            pl.BlockSpec((1, D), lambda b: (0, 0)),                   # beta
            pl.BlockSpec((D, 3 * inner), lambda b: (0, 0)),           # w_qkv
            pl.BlockSpec((inner, Dp), lambda b: (0, 0)),              # w_out
            pl.BlockSpec((1, Dp), lambda b: (0, 0)),                  # b_out
        ],
        out_specs=pl.BlockSpec((block_batch, N, Dp), lambda b: (b, 0, 0)),
        compiler_params=pltpu.CompilerParams(**cp_kwargs),
    )(x, params["gamma"], params["beta"], params["w_qkv"],
      params["w_out"], params["b_out"])
    return out[..., :D] if Dp != D else out


def attention_reference(x, gamma, beta, w_qkv, w_out, b_out, *, heads,
                        dim_head):
    """Plain-JAX reference for correctness checking."""
    B, N, D = x.shape
    inner = heads * dim_head
    scale = dim_head ** (-0.5)
    mean = jnp.mean(x, axis=-1, keepdims=True)
    var = jnp.mean((x - mean) ** 2, axis=-1, keepdims=True)
    xn = (x - mean) * jax.lax.rsqrt(var + 1e-5) * gamma + beta
    qkv = xn @ w_qkv
    q, k, v = jnp.split(qkv, 3, axis=-1)

    def to_heads(t):
        return t.reshape(B, N, heads, dim_head).transpose(0, 2, 1, 3)

    q, k, v = map(to_heads, (q, k, v))
    dots = jnp.einsum("bhnd,bhmd->bhnm", q, k) * scale
    attn = jax.nn.softmax(dots, axis=-1)
    out = jnp.einsum("bhnm,bhmd->bhnd", attn, v)
    out = out.transpose(0, 2, 1, 3).reshape(B, N, inner)
    return out @ w_out + b_out


# TODO(synk): project_out=False branch (heads==1 and dim_head==dim -> Identity
# to_out) is not implemented; the module's shapes here always project.

if __name__ == "__main__":
    # Small shapes consistent with the module: dim=32, heads=4, dim_head=16
    B, N, D = 2, 8, 32
    heads, dim_head = 4, 16
    inner = heads * dim_head

    key = jax.random.PRNGKey(0)
    kx, kg, kb, kqkv, kw, kbo = jax.random.split(key, 6)

    x = jax.random.normal(kx, (B, N, D), dtype=jnp.float32)
    gamma = 1.0 + 0.1 * jax.random.normal(kg, (D,), dtype=jnp.float32)
    beta = 0.1 * jax.random.normal(kb, (D,), dtype=jnp.float32)
    w_qkv = 0.05 * jax.random.normal(kqkv, (D, 3 * inner), dtype=jnp.float32)
    w_out = 0.05 * jax.random.normal(kw, (inner, D), dtype=jnp.float32)
    b_out = 0.1 * jax.random.normal(kbo, (D,), dtype=jnp.float32)

    # one-time parameter prep (hoisted out of the forward path)
    params = prepare_attention_params(gamma, beta, w_qkv, w_out, b_out,
                                      heads=heads, dim_head=dim_head)
    y_ref = attention_reference(x, gamma, beta, w_qkv, w_out, b_out,
                                heads=heads, dim_head=dim_head)

    # f32-operand path: tight check
    y_f32 = attention_forward(x, params, compute_dtype=None)
    y_f32 = jax.block_until_ready(y_f32)
    assert jnp.allclose(y_f32, y_ref, atol=1e-3, rtol=1e-3), \
        "f32 kernel mismatch vs reference"

    # default bf16-operand path (f32 accumulation): looser check
    y_bf16 = attention_forward(x, params)
    y_bf16 = jax.block_until_ready(y_bf16)
    assert jnp.allclose(y_bf16, y_ref, atol=5e-2, rtol=5e-2), \
        "bf16 kernel mismatch vs reference"

    print("KERNEL_OK")
</pallas_src>

<mosaic_0001>
module attributes {stable_mosaic.version = 11 : i64} {
  func.func @attention_kernel(%arg0: i32, %arg1: memref<1x8x32xf32, #tpu.memory_space<vmem>>, %arg2: memref<1x32xf32, #tpu.memory_space<vmem>>, %arg3: memref<1x32xf32, #tpu.memory_space<vmem>>, %arg4: memref<32x192xf32, #tpu.memory_space<vmem>>, %arg5: memref<64x128xf32, #tpu.memory_space<vmem>>, %arg6: memref<1x128xf32, #tpu.memory_space<vmem>>, %arg7: memref<1x8x128xf32, #tpu.memory_space<vmem>>) attributes {dimension_semantics = [#tpu.dimension_semantics<parallel>], iteration_bounds = array<i64: 2>, scalar_prefetch = 0 : i64, scratch_operands = 0 : i64, tpu.core_type = #tpu.core_type<tc>, window_params = [{transform_indices = @transform_0, window_bounds = array<i64: 1, 8, 32>}, {pipeline_mode = #tpu.pipeline_mode<synchronous>, transform_indices = @transform_1, window_bounds = array<i64: 1, 32>}, {pipeline_mode = #tpu.pipeline_mode<synchronous>, transform_indices = @transform_2, window_bounds = array<i64: 1, 32>}, {pipeline_mode = #tpu.pipeline_mode<synchronous>, transform_indices = @transform_3, window_bounds = array<i64: 32, 192>}, {pipeline_mode = #tpu.pipeline_mode<synchronous>, transform_indices = @transform_4, window_bounds = array<i64: 64, 128>}, {pipeline_mode = #tpu.pipeline_mode<synchronous>, transform_indices = @transform_5, window_bounds = array<i64: 1, 128>}, {transform_indices = @transform_6, window_bounds = array<i64: 1, 8, 128>}]} {
    %c0 = arith.constant 0 : index
    %c0_0 = arith.constant 0 : index
    %c0_1 = arith.constant 0 : index
    %0 = vector.load %arg1[%c0, %c0_0, %c0_1] : memref<1x8x32xf32, #tpu.memory_space<vmem>>, vector<1x8x32xf32>
    %cst = arith.constant dense<0.000000e+00> : vector<1x8xf32>
    %1 = vector.multi_reduction <add>, %0, %cst [2] : vector<1x8x32xf32> to vector<1x8xf32>
    %2 = vector.shape_cast %1 : vector<1x8xf32> to vector<1x8x1xf32>
    %cst_2 = arith.constant 3.200000e+01 : f32
    %3 = vector.broadcast %cst_2 : f32 to vector<1x8x1xf32>
    %4 = arith.divf %2, %3 : vector<1x8x1xf32>
    %5 = vector.broadcast %4 : vector<1x8x1xf32> to vector<1x8x32xf32>
    %6 = arith.subf %0, %5 : vector<1x8x32xf32>
    %7 = arith.mulf %6, %6 : vector<1x8x32xf32>
    %cst_3 = arith.constant dense<0.000000e+00> : vector<1x8xf32>
    %8 = vector.multi_reduction <add>, %7, %cst_3 [2] : vector<1x8x32xf32> to vector<1x8xf32>
    %9 = vector.shape_cast %8 : vector<1x8xf32> to vector<1x8x1xf32>
    %cst_4 = arith.constant 3.200000e+01 : f32
    %10 = vector.broadcast %cst_4 : f32 to vector<1x8x1xf32>
    %11 = arith.divf %9, %10 : vector<1x8x1xf32>
    %12 = vector.broadcast %4 : vector<1x8x1xf32> to vector<1x8x32xf32>
    %13 = arith.subf %0, %12 : vector<1x8x32xf32>
    %cst_5 = arith.constant 9.99999974E-6 : f32
    %14 = vector.broadcast %cst_5 : f32 to vector<1x8x1xf32>
    %15 = arith.addf %11, %14 : vector<1x8x1xf32>
    %16 = math.rsqrt %15 : vector<1x8x1xf32>
    %17 = vector.broadcast %16 : vector<1x8x1xf32> to vector<1x8x32xf32>
    %18 = arith.mulf %13, %17 : vector<1x8x32xf32>
    %c0_6 = arith.constant 0 : index
    %c0_7 = arith.constant 0 : index
    %19 = vector.load %arg2[%c0_6, %c0_7] : memref<1x32xf32, #tpu.memory_space<vmem>>, vector<1x32xf32>
    %20 = vector.shape_cast %19 : vector<1x32xf32> to vector<1x1x32xf32>
    %21 = vector.broadcast %20 : vector<1x1x32xf32> to vector<1x8x32xf32>
    %22 = arith.mulf %18, %21 : vector<1x8x32xf32>
    %c0_8 = arith.constant 0 : index
    %c0_9 = arith.constant 0 : index
    %23 = vector.load %arg3[%c0_8, %c0_9] : memref<1x32xf32, #tpu.memory_space<vmem>>, vector<1x32xf32>
    %24 = vector.shape_cast %23 : vector<1x32xf32> to vector<1x1x32xf32>
    %25 = vector.broadcast %24 : vector<1x1x32xf32> to vector<1x8x32xf32>
    %26 = arith.addf %22, %25 : vector<1x8x32xf32>
    %27 = vector.shape_cast %26 : vector<1x8x32xf32> to vector<8x32xf32>
    %c0_10 = arith.constant 0 : index
    %c0_11 = arith.constant 0 : index
    %28 = vector.load %arg4[%c0_10, %c0_11] : memref<32x192xf32, #tpu.memory_space<vmem>>, vector<32x192xf32>
    %cst_12 = arith.constant dense<0.000000e+00> : vector<8x192xf32>
    %29 = tpu.matmul %27, %28, %cst_12 {dimension_numbers = #tpu.dot_dimension_numbers<[1], [0], [0], [1], [0, 0, 1, 1], [], []>} : vector<8x32xf32>, vector<32x192xf32>, vector<8x192xf32> -> vector<8x192xf32>
    %30 = vector.shape_cast %29 : vector<8x192xf32> to vector<1x8x192xf32>
    %31 = vector.extract_strided_slice %30 {offsets = [0, 0, 0], sizes = [1, 8, 16], strides = [1, 1, 1]} : vector<1x8x192xf32> to vector<1x8x16xf32>
    %32 = vector.extract_strided_slice %30 {offsets = [0, 0, 16], sizes = [1, 8, 16], strides = [1, 1, 1]} : vector<1x8x192xf32> to vector<1x8x16xf32>
    %33 = vector.extract_strided_slice %30 {offsets = [0, 0, 32], sizes = [1, 8, 16], strides = [1, 1, 1]} : vector<1x8x192xf32> to vector<1x8x16xf32>
    %34 = vector.extract_strided_slice %30 {offsets = [0, 0, 48], sizes = [1, 8, 16], strides = [1, 1, 1]} : vector<1x8x192xf32> to vector<1x8x16xf32>
    %35 = vector.shape_cast %31 : vector<1x8x16xf32> to vector<1x1x8x16xf32>
    %36 = vector.shape_cast %32 : vector<1x8x16xf32> to vector<1x1x8x16xf32>
    %37 = vector.shape_cast %33 : vector<1x8x16xf32> to vector<1x1x8x16xf32>
    %38 = vector.shape_cast %34 : vector<1x8x16xf32> to vector<1x1x8x16xf32>
    %39 = tpu.concatenate %35, %36, %37, %38 in 1 : vector<1x1x8x16xf32>, vector<1x1x8x16xf32>, vector<1x1x8x16xf32>, vector<1x1x8x16xf32> -> vector<1x4x8x16xf32>
    %40 = vector.shape_cast %39 : vector<1x4x8x16xf32> to vector<4x8x16xf32>
    %41 = vector.extract_strided_slice %30 {offsets = [0, 0, 64], sizes = [1, 8, 16], strides = [1, 1, 1]} : vector<1x8x192xf32> to vector<1x8x16xf32>
    %42 = vector.extract_strided_slice %30 {offsets = [0, 0, 80], sizes = [1, 8, 16], strides = [1, 1, 1]} : vector<1x8x192xf32> to vector<1x8x16xf32>
    %43 = vector.extract_strided_slice %30 {offsets = [0, 0, 96], sizes = [1, 8, 16], strides = [1, 1, 1]} : vector<1x8x192xf32> to vector<1x8x16xf32>
    %44 = vector.extract_strided_slice %30 {offsets = [0, 0, 112], sizes = [1, 8, 16], strides = [1, 1, 1]} : vector<1x8x192xf32> to vector<1x8x16xf32>
    %45 = vector.shape_cast %41 : vector<1x8x16xf32> to vector<1x1x8x16xf32>
    %46 = vector.shape_cast %42 : vector<1x8x16xf32> to vector<1x1x8x16xf32>
    %47 = vector.shape_cast %43 : vector<1x8x16xf32> to vector<1x1x8x16xf32>
    %48 = vector.shape_cast %44 : vector<1x8x16xf32> to vector<1x1x8x16xf32>
    %49 = tpu.concatenate %45, %46, %47, %48 in 1 : vector<1x1x8x16xf32>, vector<1x1x8x16xf32>, vector<1x1x8x16xf32>, vector<1x1x8x16xf32> -> vector<1x4x8x16xf32>
    %50 = vector.shape_cast %49 : vector<1x4x8x16xf32> to vector<4x8x16xf32>
    %51 = vector.extract_strided_slice %30 {offsets = [0, 0, 128], sizes = [1, 8, 16], strides = [1, 1, 1]} : vector<1x8x192xf32> to vector<1x8x16xf32>
    %52 = vector.extract_strided_slice %30 {offsets = [0, 0, 144], sizes = [1, 8, 16], strides = [1, 1, 1]} : vector<1x8x192xf32> to vector<1x8x16xf32>
    %53 = vector.extract_strided_slice %30 {offsets = [0, 0, 160], sizes = [1, 8, 16], strides = [1, 1, 1]} : vector<1x8x192xf32> to vector<1x8x16xf32>
    %54 = vector.extract_strided_slice %30 {offsets = [0, 0, 176], sizes = [1, 8, 16], strides = [1, 1, 1]} : vector<1x8x192xf32> to vector<1x8x16xf32>
    %55 = vector.shape_cast %51 : vector<1x8x16xf32> to vector<1x1x8x16xf32>
    %56 = vector.shape_cast %52 : vector<1x8x16xf32> to vector<1x1x8x16xf32>
    %57 = vector.shape_cast %53 : vector<1x8x16xf32> to vector<1x1x8x16xf32>
    %58 = vector.shape_cast %54 : vector<1x8x16xf32> to vector<1x1x8x16xf32>
    %59 = tpu.concatenate %55, %56, %57, %58 in 1 : vector<1x1x8x16xf32>, vector<1x1x8x16xf32>, vector<1x1x8x16xf32>, vector<1x1x8x16xf32> -> vector<1x4x8x16xf32>
    %60 = vector.shape_cast %59 : vector<1x4x8x16xf32> to vector<4x8x16xf32>
    "tpu.trace_start"() <{level = 10 : i32, message = "gqd,gkd->gqk"}> : () -> ()
    %cst_13 = arith.constant dense<0.000000e+00> : vector<4x8x8xf32>
    %61 = tpu.matmul %40, %50, %cst_13 {dimension_numbers = #tpu.dot_dimension_numbers<[2], [2], [1], [1], [0, 0, 0, 1, 1, 1], [0], [0]>} : vector<4x8x16xf32>, vector<4x8x16xf32>, vector<4x8x8xf32> -> vector<4x8x8xf32>
    "tpu.trace_stop"() : () -> ()
    %cst_14 = arith.constant dense<0xFF800000> : vector<4x8xf32>
    %62 = vector.multi_reduction <maximumf>, %61, %cst_14 [2] : vector<4x8x8xf32> to vector<4x8xf32>
    %63 = vector.shape_cast %62 : vector<4x8xf32> to vector<4x8x1xf32>
    %64 = vector.broadcast %63 : vector<4x8x1xf32> to vector<4x8x8xf32>
    %65 = arith.subf %61, %64 : vector<4x8x8xf32>
    %66 = math.exp %65 : vector<4x8x8xf32>
    %cst_15 = arith.constant dense<0.000000e+00> : vector<4x8xf32>
    %67 = vector.multi_reduction <add>, %66, %cst_15 [2] : vector<4x8x8xf32> to vector<4x8xf32>
    %68 = vector.shape_cast %67 : vector<4x8xf32> to vector<4x8x1xf32>
    "tpu.trace_start"() <{level = 10 : i32, message = "gqk,gkd->gqd"}> : () -> ()
    %cst_16 = arith.constant dense<0.000000e+00> : vector<4x8x16xf32>
    %69 = tpu.matmul %66, %60, %cst_16 {dimension_numbers = #tpu.dot_dimension_numbers<[2], [1], [1], [2], [0, 0, 0, 1, 1, 2], [0], [0]>} : vector<4x8x8xf32>, vector<4x8x16xf32>, vector<4x8x16xf32> -> vector<4x8x16xf32>
    "tpu.trace_stop"() : () -> ()
    %70 = tpu.reciprocal %68 {approx = true} : vector<4x8x1xf32> -> vector<4x8x1xf32>
    %71 = vector.broadcast %70 : vector<4x8x1xf32> to vector<4x8x16xf32>
    %72 = arith.mulf %69, %71 : vector<4x8x16xf32>
    %73 = vector.shape_cast %72 : vector<4x8x16xf32> to vector<1x4x8x16xf32>
    %74 = vector.extract_strided_slice %73 {offsets = [0, 0, 0, 0], sizes = [1, 1, 8, 16], strides = [1, 1, 1, 1]} : vector<1x4x8x16xf32> to vector<1x1x8x16xf32>
    %75 = vector.shape_cast %74 : vector<1x1x8x16xf32> to vector<1x8x16xf32>
    %76 = vector.extract_strided_slice %73 {offsets = [0, 1, 0, 0], sizes = [1, 1, 8, 16], strides = [1, 1, 1, 1]} : vector<1x4x8x16xf32> to vector<1x1x8x16xf32>
    %77 = vector.shape_cast %76 : vector<1x1x8x16xf32> to vector<1x8x16xf32>
    %78 = vector.extract_strided_slice %73 {offsets = [0, 2, 0, 0], sizes = [1, 1, 8, 16], strides = [1, 1, 1, 1]} : vector<1x4x8x16xf32> to vector<1x1x8x16xf32>
    %79 = vector.shape_cast %78 : vector<1x1x8x16xf32> to vector<1x8x16xf32>
    %80 = vector.extract_strided_slice %73 {offsets = [0, 3, 0, 0], sizes = [1, 1, 8, 16], strides = [1, 1, 1, 1]} : vector<1x4x8x16xf32> to vector<1x1x8x16xf32>
    %81 = vector.shape_cast %80 : vector<1x1x8x16xf32> to vector<1x8x16xf32>
    %82 = tpu.concatenate %75, %77, %79, %81 in 2 : vector<1x8x16xf32>, vector<1x8x16xf32>, vector<1x8x16xf32>, vector<1x8x16xf32> -> vector<1x8x64xf32>
    %83 = vector.shape_cast %82 : vector<1x8x64xf32> to vector<8x64xf32>
    %c0_17 = arith.constant 0 : index
    %c0_18 = arith.constant 0 : index
    %84 = vector.load %arg5[%c0_17, %c0_18] : memref<64x128xf32, #tpu.memory_space<vmem>>, vector<64x128xf32>
    %cst_19 = arith.constant dense<0.000000e+00> : vector<8x128xf32>
    %85 = tpu.matmul %83, %84, %cst_19 {dimension_numbers = #tpu.dot_dimension_numbers<[1], [0], [0], [1], [0, 0, 1, 1], [], []>} : vector<8x64xf32>, vector<64x128xf32>, vector<8x128xf32> -> vector<8x128xf32>
    %c0_20 = arith.constant 0 : index
    %c0_21 = arith.constant 0 : index
    %86 = vector.load %arg6[%c0_20, %c0_21] : memref<1x128xf32, #tpu.memory_space<vmem>>, vector<1x128xf32>
    %87 = vector.broadcast %86 : vector<1x128xf32> to vector<8x128xf32>
    %88 = arith.addf %85, %87 : vector<8x128xf32>
    %89 = vector.shape_cast %88 : vector<8x128xf32> to vector<1x8x128xf32>
    %c0_22 = arith.constant 0 : index
    %c0_23 = arith.constant 0 : index
    %c0_24 = arith.constant 0 : index
    %90 = vector.load %arg7[%c0_22, %c0_23, %c0_24] : memref<1x8x128xf32, #tpu.memory_space<vmem>>, vector<1x8x128xf32>
    tpu.vector_store %arg7[%c0_22, %c0_23, %c0_24], %89 {strides = array<i32>} : memref<1x8x128xf32, #tpu.memory_space<vmem>>, vector<1x8x128xf32>,
    return
  }
  func.func @transform_0(%arg0: i32) -> (i32, i32, i32) {
    %c0_i32 = arith.constant 0 : i32
    %c0_i32_0 = arith.constant 0 : i32
    %c0_i32_1 = arith.constant 0 : i32
    return %arg0, %c0_i32, %c0_i32_0 : i32, i32, i32
  }
  func.func @transform_1(%arg0: i32) -> (i32, i32) {
    %c0_i32 = arith.constant 0 : i32
    %c0_i32_0 = arith.constant 0 : i32
    %c0_i32_1 = arith.constant 0 : i32
    return %c0_i32, %c0_i32_0 : i32, i32
  }
  func.func @transform_2(%arg0: i32) -> (i32, i32) {
    %c0_i32 = arith.constant 0 : i32
    %c0_i32_0 = arith.constant 0 : i32
    %c0_i32_1 = arith.constant 0 : i32
    return %c0_i32, %c0_i32_0 : i32, i32
  }
  func.func @transform_3(%arg0: i32) -> (i32, i32) {
    %c0_i32 = arith.constant 0 : i32
    %c0_i32_0 = arith.constant 0 : i32
    %c0_i32_1 = arith.constant 0 : i32
    return %c0_i32, %c0_i32_0 : i32, i32
  }
  func.func @transform_4(%arg0: i32) -> (i32, i32) {
    %c0_i32 = arith.constant 0 : i32
    %c0_i32_0 = arith.constant 0 : i32
    %c0_i32_1 = arith.constant 0 : i32
    return %c0_i32, %c0_i32_0 : i32, i32
  }
  func.func @transform_5(%arg0: i32) -> (i32, i32) {
    %c0_i32 = arith.constant 0 : i32
    %c0_i32_0 = arith.constant 0 : i32
    %c0_i32_1 = arith.constant 0 : i32
    return %c0_i32, %c0_i32_0 : i32, i32
  }
  func.func @transform_6(%arg0: i32) -> (i32, i32, i32) {
    %c0_i32 = arith.constant 0 : i32
    %c0_i32_0 = arith.constant 0 : i32
    %c0_i32_1 = arith.constant 0 : i32
    return %arg0, %c0_i32, %c0_i32_0 : i32, i32, i32
  }
}

</mosaic_0001>

<bundles_post_ra>
// kernel: tpu_custom_call.1
= control target key start
LH: loop header
LB: loop body
LE: loop exit
PB: predicated region body
PF: predicated region fallthrough
CT: control target
= control target key end

     0   :  { %11 = vsyncpa [#allocation3], 0  ;;  %s2023_s0 = inlined_call_operand.hbm [shape: f32[2,8,32], index: 0, kind: input, shape index: {}]   ;;  %s2024_s1 = inlined_call_operand.vmem [shape: f32[1,32], index: 1, kind: input, shape index: {}]   ;;  %s2025_s2 = inlined_call_operand.vmem [shape: f32[1,32], index: 2, kind: input, shape index: {}]   ;;  %s2026_s3 = inlined_call_operand.hbm [shape: f32[32,192], index: 3, kind: input, shape index: {}]   ;;  %s2027_s4 = inlined_call_operand.hbm [shape: f32[64,128], index: 4, kind: input, shape index: {}]   ;;  %s2028_s5 = inlined_call_operand.vmem [shape: f32[1,128], index: 5, kind: input, shape index: {}]   ;;  %s2029_s6 = inlined_call_operand.hbm [shape: f32[2,8,128], index: 6, kind: output, shape index: {}]  }
   0x1   :  { %13 = vsyncpa [#allocation3 + $0x1], 0 }
   0x2   :  { %14 = vsyncpa [#allocation6], 0 }
   0x3   :  { %15 = vsyncpa [#allocation4], 0 }
   0x4   :  { %17 = vsyncpa [#allocation4 + $0x1], 0  ;;  %s1725_s21 = smov 0   ;;  %s1727_s22 = smov 0  }
   0x5   :  { %s1729_s23 = smov 0   ;;  %s1731_s24 = smov 0  }
   0x6 LB: > { %s1746_s25 = sadd.s32 4294967295, %s1670_s24   ;;  %s1278_s26 = sadd.s32 4294967294, %s1670_s24   ;;  %s1670_s24 = sphi %s1731_s24, %s2049_s24   ;;  %s1666_s23 = sphi %s1729_s23, %s2048_s23   ;;  %s1662_s22 = sphi %s1727_s22, %s2047_s22   ;;  %s1658_s21 = sphi %s1725_s21, %s2046_s21  }
   0x7   : > { %p43_p0 = scmp.ne.s32.totalorder %s1662_s22, %s1658_s21  ;;  %p2030_p1 = scmp.eq.s32.totalorder %s1746_s25, 0 }
   0x8   : > { %p178_p3 = scmp.eq.s32.totalorder %s1278_s26, 1  ;;  %p1279_p5 = scmp.ge.s32.totalorder %s1670_s24, 1 }
   0x9   : > { %p1755_p4 = por %p2030_p1, %p43_p0  ;;  %p185_p7 = scmp.lt.s32.totalorder %s1670_s24, 3 }
   0xa   : > { %p1760_p6 = por %p178_p3, %p43_p0  ;;  %s1672_s30 = smov [#allocation5]  }
   0xb   : > { %s2033_s27 = scalar_select %p1755_p4, 1, 0 }
   0xc   : > { %s2034_s28 = scalar_select %p1760_p6, 1, 0 }
   0xd   : > { %p1765_p8 = pnand %p1279_p5, %p185_p7  ;;  %s203_s7 = sshll.u32 %s1672_s30, 4  ;;  %s1769_s7 = int_to_ptr.vmem [resolvable:$true] %s203_s7 }
   0xe   : > { %s1673_s9 = smov [#allocation7]   ;;  %s1514_s13 = scalar_lea.hbm %s2026_s3, 1024 }
   0xf   : > { %p1427_p9 = pneg %p1765_p8  ;;  %s216_s10 = sshll.u32 %s1673_s9, 4  ;;  %s1780_s10 = int_to_ptr.vmem [resolvable:$true] %s216_s10 }
  0x10   : > { %p1515_p12 = scmp.ne.s32.totalorder %s2026_s3, %s1514_s13  ;;  %p1521_p5 = scmp.lt.u32.totalorder %s1514_s13, %s2026_s3 }
  0x11   : > { %p1776_p11 = pnand %p1427_p9, %p2030_p1 }
  0x13   : > { %p1516_p13 = pneg %p1776_p11 }
  0x15   : > { %p1517_p0 = pnand %p1516_p13, %p1515_p12 }
  0x17   : > { %p1518_p3 = pneg %p1517_p0 }
  0x19   : > { %p1523_p7 = pnand %p1521_p5, %p1518_p3 }
  0x1b   : > { %1526 = shalt.err (!%p1523_p7)
}
  0x1c   : > { %s1527_s18 = scalar_lea.vmem %s1769_s7, 1024  ;;  %p1535_p2 = scmp.lt.s32.totalorder %s1769_s7, %s1769_s7 }
  0x1d   : > { %p1528_p9 = scmp.ne.s32.totalorder %s1769_s7, %s1527_s18  ;;  %p1536_p12 = scmp.lt.s32.totalorder %s1527_s18, %s1527_s18 }
  0x1f   : > { %p1530_p10 = pnand %p1528_p9, %p1516_p13  ;;  %p1537_p0 = por %p1536_p12, %p1535_p2 }
  0x21   : > { %p1531_p1 = pneg %p1530_p10 }
  0x23   : > { %p1538_p6 = pnand %p1537_p0, %p1531_p1 }
  0x25   : > { %1541 = shalt.err (!%p1538_p6)
}
  0x26   : > { %s1674_s19 = smov 256   ;;  %s1675_s20 = smov 16  }
  0x27   : > { %1430 = dma.hbm_to_vmem [thread:$0]  (!%p1776_p11), %s2026_s3, 1024, %s1769_s7, [#allocation6], %s1674_s19, %s1674_s19, %s1675_s20  }
  0x28   : > { %s1542_s12 = scalar_lea.hbm %s2027_s4, 1024 }
  0x29   : > { %p1543_p2 = scmp.ne.s32.totalorder %s2027_s4, %s1542_s12  ;;  %p1549_p10 = scmp.lt.u32.totalorder %s1542_s12, %s2027_s4 }
  0x2b   : > { %p1545_p1 = pnand %p1543_p2, %p1516_p13 }
  0x2d   : > { %p1546_p6 = pneg %p1545_p1 }
  0x2f   : > { %p1551_p3 = pnand %p1549_p10, %p1546_p6 }
  0x31   : > { %1554 = shalt.err (!%p1551_p3)
}
  0x32   : > { %s1555_s7 = scalar_lea.vmem %s1780_s10, 1024  ;;  %p1563_p12 = scmp.lt.s32.totalorder %s1780_s10, %s1780_s10 }
  0x33   : > { %p1556_p5 = scmp.ne.s32.totalorder %s1780_s10, %s1555_s7  ;;  %p1564_p0 = scmp.lt.s32.totalorder %s1555_s7, %s1555_s7 }
  0x35   : > { %p1558_p7 = pnand %p1556_p5, %p1516_p13  ;;  %p1565_p2 = por %p1564_p0, %p1563_p12 }
  0x37   : > { %p1559_p9 = pneg %p1558_p7 }
  0x39   : > { %p1566_p1 = pnand %p1565_p2, %p1559_p9 }
  0x3b   : > { %1569 = shalt.err (!%p1566_p1)
}
  0x3c   : > { %s1676_s17 = smov 128   ;;  %s1677_s18 = smov 8  }
  0x3d   : > { %1433 = dma.hbm_to_vmem [thread:$0]  (!%p1776_p11), %s2027_s4, 1024, %s1780_s10, [#allocation6], %s1676_s17, %s1676_s17, %s1677_s18  }
  0x3e   : > { %s1835_s26 = sadd.s32 1, %s1670_s24   ;;  %s30_s9 = sadd.s32 1, %s1666_s23 }
  0x3f   : > { %s27_s30 = ssub.s32 %s1670_s24, %s1835_s26  ;;  %p37_p6 = scmp.ne.s32.totalorder %s1666_s23, %s1662_s22 }
  0x40   : > { %p28_p13 = scmp.eq.s32.totalorder %s27_s30, 0  ;;  %p38_p10 = scmp.eq.s32.totalorder %s1670_s24, 0 }
  0x41   : > { %p2037_p5 = scmp.eq.s32.totalorder %s1746_s25, 1  ;;  %p1444_p9 = scmp.lt.s32.totalorder %s1670_s24, 2 }
  0x42   : > { %s1844_s11 = scalar_select %p28_p13, %s1666_s23, %s30_s9  }
  0x43   : > { %p39_p3 = por %p38_p10, %p37_p6  ;;  %p1848_p7 = por %p2037_p5, %p37_p6 }
  0x44   : > { %s233_s8 = sand.u32 1, %s1666_s23   ;;  %s1284_s10 = sshll.u32 %s1670_s24, 7 }
  0x45   : > { %s2038_s12 = scalar_select %p1848_p7, 1, 0 }
  0x46   : > { %s1283_s13 = sshll.u32 %s233_s8, 3  ;;  %s1858_s16 = scalar_lea.hbm %s2023_s0, %s1284_s10 }
  0x47   : > { %s237_s7 = scalar_lea.vmem [#allocation2], %s1283_s13  ;;  %p1862_p11 = pnand %p1444_p9, %p39_p3 }
  0x48   : > { %s244_s17 = sshll.u32 %s237_s7, 4  ;;  %s234_s19 = scalar_lea.sflag [#allocation3], %s233_s8  ;;  %s1860_s17 = int_to_ptr.vmem [resolvable:$true] %s244_s17 }
  0x49   : > { %s1570_s20 = scalar_lea.hbm %s1858_s16, 128  ;;  %p1572_p0 = pneg %p1862_p11 }
  0x4a   : > { %p1571_p12 = scmp.ne.s32.totalorder %s1858_s16, %s1570_s20  ;;  %s1575_s13 = scalar_lea.hbm %s2023_s0, 256 }
  0x4b   : > { %p1576_p13 = scmp.lt.u32.totalorder %s1858_s16, %s2023_s0  ;;  %p1577_p6 = scmp.lt.u32.totalorder %s1575_s13, %s1570_s20 }
  0x4c   : > { %p1573_p2 = pnand %p1572_p0, %p1571_p12  ;;  %p1579_p3 = scmp.lt.u32.totalorder %s1570_s20, %s1858_s16 }
  0x4d   : > { %p1578_p10 = por %p1577_p6, %p1576_p13 }
  0x4e   : > { %p1574_p1 = pneg %p1573_p2 }
  0x4f   : > { %p1580_p5 = por %p1579_p3, %p1578_p10 }
  0x51   : > { %p1581_p9 = pnand %p1580_p5, %p1574_p1 }
  0x53   : > { %1584 = shalt.err (!%p1581_p9)
}
  0x54   : > { %s1585_s8 = scalar_lea.vmem %s1860_s17, 128  ;;  %s1678_s15 = smov [#allocation2]  }
  0x55   : > { %p1586_p12 = scmp.ne.s32.totalorder %s1860_s17, %s1585_s8  ;;  %s1590_s7 = sshll.u32 %s1678_s15, 4  ;;  %s1591_s7 = int_to_ptr.vmem [resolvable:$false] %s1590_s7 }
  0x56   : > { %s1592_s30 = scalar_lea.vmem %s1591_s7, 256  ;;  %p1593_p4 = scmp.lt.s32.totalorder %s1860_s17, %s1591_s7 }
  0x57   : > { %p1588_p2 = pnand %p1586_p12, %p1572_p0  ;;  %p1594_p13 = scmp.lt.s32.totalorder %s1592_s30, %s1585_s8 }
  0x59   : > { %p1589_p7 = pneg %p1588_p2  ;;  %p1595_p6 = por %p1594_p13, %p1593_p4 }
  0x5b   : > { %p1596_p10 = pnand %p1595_p6, %p1589_p7 }
  0x5d   : > { %1599 = shalt.err (!%p1596_p10)
}
  0x5e   : > { %1437 = dma.hbm_to_vmem [thread:$0]  (!%p1862_p11), %s1858_s16, 128, %s1860_s17, %s234_s19  }
  0x5f   : > { %253 = sbr.rel (%p1765_p8) target bundleno = 1801 (0x709), region = 44  ;;  %s1894_s20 = sand.u32 (!%p1765_p8), 1, %s1662_s22  }
  0x60   : > { %s1286_s9 = sshll.u32 (!%p1765_p8), %s1894_s20, 3  ;;  %s256_s13 = scalar_lea.sflag (!%p1765_p8), [#allocation3], %s1894_s20 }
  0x61   : > { %s259_s10 = scalar_lea.vmem (!%p1765_p8), [#allocation2], %s1286_s9  ;;  %p2040_p4 = scmp.ne.s32.totalorder (!%p1765_p8), %s2033_s27, 0 }
  0x66   : > { %1645 = dma.done.wait (%p2040_p4), %s256_s13, 128  }
  0x67   : > { %1647 = vsyncadd (%p2040_p4), %s256_s13, 4294967168  ;;  %p2041_p7 = scmp.eq.s32.totalorder %s1746_s25, 0 }
  0x69   : > { %1649 = dma.done.wait (%p2041_p7), [#allocation6], 2048   ;;  %p2042_p8 = pmov %p2041_p7 }
  0x6a   : > { %vm297_vm0 = vcmask 261120   ;;  %v296_v0 = vld [vmem:[%s259_s10] sm:$0xff]  ;;  %v329_v7 = vld [vmem:[#allocation5 + $0x8] sm:$0xff]  ;;  %v328_v9 = vld [vmem:[#allocation5] sm:$0xff]  ;;  %v1679_v14 = vmov 0.0   ;;  %vm1680_vm1 = vmmov 0  }
  0x6b   : > { %1651 = vsyncadd (%p2042_p8), [#allocation6], 4294965248  ;;  %v298_v1 = vsel %vm297_vm0, %v296_v0, 0.0  ;;  %v331_v8 = vld [vmem:[#allocation5 + $0x18] sm:$0xff]  ;;  %v330_v11 = vld [vmem:[#allocation5 + $0x10] sm:$0xff]  ;;  %403 = vmatprep.mubr.f32.mxu1 %v1679_v14  ;;  %1346 = vmatprep.subr.mxu0 %v1679_v14  ;;  %s1681_s18 = smov 80  }
  0x6c   : > { %299 = vadd.xlane.f32.xlu0 %v298_v1  ;;  %v1395_v10 = vpack.c.bf16 %v331_v8, %v329_v7  ;;  %v333_v12 = vld [vmem:[#allocation5 + $0x28] sm:$0xff]  ;;  %v335_v13 = vld [vmem:[#allocation5 + $0x38] sm:$0xff]  ;;  %v1397_v15 = vpack.c.bf16 %v330_v11, %v328_v9  ;;  %v332_v17 = vld [vmem:[#allocation5 + $0x20] sm:$0xff]  ;;  %1348 = vmatprep.mubr.msk.f32.mxu0 %vm1680_vm1, %v1679_v14  ;;  %s1682_s19 = smov 112   ;;  %s1683_s14 = smov 96   ;;  %vm429_vm2 = vcmask 130048  }
  0x6d   : > { %v1399_v16 = vpack.c.bf16 %v335_v13, %v333_v12  ;;  %v334_v18 = vld [vmem:[#allocation5 + $0x30] sm:$0xff]  ;;  %s1684_s8 = smov 64   ;;  %vm732_vm3 = vcmask 64512   ;;  %v1085_v9 = vld [vmem:[#allocation7] sm:$0xff]  ;;  %v1685_v12 = vmov 0.0|0.0   ;;  %s1686_s15 = smov 16  }
  0x6e   : > { %1396 = vmatprep.subr.bf16.mxu1 %v1395_v10  ;;  %v1401_v19 = vpack.c.bf16 %v334_v18, %v332_v17  ;;  %v1290_v24 = vld [vmem:[%s2024_s1] ss:$0 sm:$0xff]  ;;  %v1086_v10 = vld [vmem:[#allocation7 + $0x8] sm:$0xff]  ;;  %s1687_s7 = smov 32   ;;  %s1688_s30 = smov 48   ;;  %vm1083_vm4 = vcmask 392192  }
  0x6f   : > { %1398 = vmatpush1.bf16.msra.mxu1 %v1397_v15  ;;  %v1291_v26 = vld [vmem:[%s2025_s2] ss:$0 sm:$0xff]  ;;  %v1404_v13 = vpack.c.bf16 %v1086_v10, %v1085_v9  ;;  %v1088_v15 = vld [vmem:[#allocation7 + $0x18] sm:$0xff]  ;;  %vm1100_vm5 = vcmask 523264   ;;  %s1308_s27 = sshll.u32 %s1746_s25, 7  ;;  %s295_s29 = scalar_lea.vmem [#allocation8], %s1286_s9 }
  0x70   : > { %1400 = vmatprep.subr.bf16.mxu1 %v1399_v16  ;;  %v1087_v11 = vld [vmem:[#allocation7 + $0x10] sm:$0xff]  ;;  %s1189_s16 = sshll.u32 %s295_s29, 4  ;;  %p2043_p0 = scmp.ne.s32.totalorder %s2038_s12, 0  ;;  %s1981_s16 = int_to_ptr.vmem [resolvable:$true] %s1189_s16 }
  0x71   : > { %v1407_v16 = vpack.c.bf16 %v1088_v15, %v1087_v11  ;;  %s1689_s25 = smov [#allocation8]  }
  0x72   : > { %s1604_s9 = sshll.u32 %s1689_s25, 4  ;;  %s1605_s9 = int_to_ptr.vmem [resolvable:$false] %s1604_s9 }
  0x73   : > { %1402 = vmatpush1.bf16.msra.mxu1 %v1401_v19  ;;  %p1607_p5 = scmp.lt.s32.totalorder %s1981_s16, %s1605_s9 }
  0x74   : > { %1336 = vmatprep.subr.mxu1 %v1679_v14 }
  0xf9   : > { %v300_v2 = vpop.xlane.xlu0 %299 }
  0xfa   : > { %v302_v3 = vmul.f32 0.03125, %v300_v2 }
  0xfc   : > { %v303_v4 = vsub.f32 %v296_v0, %v302_v3 }
  0xfe   : > { %v304_v5 = vmul.f32 %v303_v4, %v303_v4 }
 0x100   : > { %v305_v6 = vsel %vm297_vm0, %v304_v5, 0.0 }
 0x101   : > { %306 = vadd.xlane.f32.xlu0 %v305_v6 }
 0x18e   : > { %v307_v20 = vpop.xlane.xlu0 %306 }
 0x18f   : > { %v308_v21 = vmul.f32 0.03125, %v307_v20  ;;  %v1089_v20 = vld [vmem:[#allocation7 + $0x20] sm:$0xff] }
 0x191   : > { %v309_v22 = vadd.f32 1e-05, %v308_v21  ;;  %v1090_v21 = vld [vmem:[#allocation7 + $0x28] sm:$0xff] }
 0x193   : > { %1496 = vrsqrt.f32 %v309_v22  ;;  %v1410_v22 = vpack.c.bf16 %v1090_v21, %v1089_v20 }
 0x19d   : > { %v1497_v23 = vpop.eup %1496 }
 0x19e   : > { %v311_v25 = vmul.f32 %v1497_v23, %v303_v4  ;;  %v1091_v23 = vld [vmem:[#allocation7 + $0x30] sm:$0xff] }
 0x1a0   : > { %v319_v27 = vmul.f32 %v1290_v24, %v311_v25  ;;  %v1092_v24 = vld [vmem:[#allocation7 + $0x38] sm:$0xff] }
 0x1a2   : > { %v327_v28 = vadd.f32 %v1291_v26, %v319_v27  ;;  %v1413_v26 = vpack.c.bf16 %v1092_v24, %v1091_v23 }
 0x1a4   : > { %1292 = vmatmul.mubr.msk.f32.vlgmr.msra.gmra.mrb[0].mxu1 %vm297_vm0, %v327_v28 }
 0x1a5   : > { %1338 = vmatprep.mubr.msk.f32.mxu1 %vm1680_vm1, %v1679_v14 }
 0x277   : > { %v405_v29 = vpop.f32.mrb[0].mxu1 }
 0x278   : > { %415 = vrot.lane.b32.xlu0 %v405_v29, %s1681_s18  ;;  %411 = vrot.lane.b32.xlu1 %v405_v29, %s1682_s19  ;;  %v407_v30 = vpop.f32.mrb[1].mxu1 }
 0x27c   : > { %413 = vrot.lane.b32.xlu1 %v405_v29, %s1683_s14 }
 0x280   : > { %427 = vrot.lane.b32.xlu1 %v405_v29, %s1684_s8 }
 0x2ea   : > { %v412_v31 = vpop.permute.xlu1 %411  ;;  %v416_v33 = vpop.permute.xlu0 %415 }
 0x2eb   : > { %504 = vrot.lane.b32.xlu1 %v412_v31, %s1684_s8 }
 0x2ee   : > { %v414_v32 = vpop.permute.xlu1 %413 }
 0x2ef   : > { %580 = vrot.lane.b32.xlu1 %v414_v32, %s1684_s8 }
 0x2f2   : > { %v428_v34 = vpop.permute.xlu1 %427 }
 0x2f3   : > { %656 = vrot.lane.b32.xlu1 %v416_v33, %s1684_s8  ;;  %1337 = vmatpush3.xpose.msk.msra.mxu1 %vm429_vm2, %v428_v34  ;;  %s1600_s8 = scalar_lea.vmem %s1981_s16, 128 }
 0x2f4   : > { %1341 = vmatprep.subr.mxu1 %v1679_v14  ;;  %p1601_p11 = scmp.ne.s32.totalorder %s1981_s16, %s1600_s8 }
 0x2f6   : > { %1339 = vmatmul.mubr.msk.f32.vlgmr.msra.gmra.mrb[2].mxu1 %vm429_vm2, %v405_v29  ;;  %p1602_p1 = pnand %p1601_p11, %p2043_p0 }
 0x2f7   : > { %418 = vrot.lane.b32.xlu1 %v407_v30, %s1682_s19  ;;  %1343 = vmatprep.mubr.msk.f32.mxu1 %vm1680_vm1, %v1679_v14  ;;  %s1979_s19 = scalar_lea.hbm %s2029_s6, %s1308_s27 }
 0x2f8   : > { %p1603_p3 = pneg %p1602_p1 }
 0x35d   : > { %v505_v35 = vpop.permute.xlu1 %504 }
 0x35e   : > { %1342 = vmatpush3.xpose.msk.msra.mxu1 %vm429_vm2, %v505_v35 }
 0x35f   : > { %1351 = vmatprep.subr.mxu1 %v1679_v14 }
 0x361   : > { %1344 = vmatmul.mubr.msk.f32.vlgmr.msra.gmra.mrb[4].mxu1 %vm429_vm2, %v412_v31  ;;  %v581_v36 = vpop.permute.xlu1 %580 }
 0x362   : > { %1347 = vmatpush3.xpose.msk.msra.mxu0 %vm429_vm2, %v581_v36  ;;  %1353 = vmatprep.mubr.msk.f32.mxu1 %vm1680_vm1, %v1679_v14 }
 0x363   : > { %1356 = vmatprep.subr.mxu0 %v1679_v14 }
 0x365   : > { %1349 = vmatmul.mubr.msk.f32.vlgmr.msra.gmra.mrb[0].mxu0 %vm429_vm2, %v414_v32  ;;  %v657_v37 = vpop.permute.xlu1 %656 }
 0x366   : > { %1352 = vmatpush3.xpose.msk.msra.mxu1 %vm429_vm2, %v657_v37  ;;  %1357 = vmatpush3.msra.mxu0 %v407_v30 }
 0x367   : > { %1361 = vmatprep.subr.mxu1 %v1679_v14  ;;  %1358 = vmatprep.mubr.msk.f32.mxu0 %vm1680_vm1, %v1679_v14 }
 0x368   : > { %1366 = vmatprep.subr.mxu0 %v1679_v14 }
 0x369   : > { %1354 = vmatmul.mubr.msk.f32.vlgmr.msra.gmra.mrb[6].mxu1 %vm429_vm2, %v416_v33  ;;  %v419_v38 = vpop.permute.xlu1 %418 }
 0x36a   : > { %1362 = vmatpush3.msra.mxu1 %v419_v38  ;;  %1363 = vmatprep.mubr.msk.f32.mxu1 %vm1680_vm1, %v1679_v14 }
 0x36b   : > { %1371 = vmatprep.subr.mxu1 %v1679_v14 }
 0x3c9   : > { %v500_v39 = vpop.f32.mrb[2].mxu1 }
 0x3ca   : > { %v1340_v40 = vpop.f32.mrb[3].mxu1  ;;  %v733_v41 = vsel %vm732_vm3, %v500_v39, -inf }
 0x3cb   : > { %734 = vmax.xlane.f32.xlu1 %v733_v41 }
 0x434   : > { %v576_v42 = vpop.f32.mrb[4].mxu1 }
 0x435   : > { %v1345_v43 = vpop.f32.mrb[5].mxu1  ;;  %v736_v44 = vsel %vm732_vm3, %v576_v42, -inf }
 0x436   : > { %737 = vmax.xlane.f32.xlu0 %v736_v44 }
 0x438   : > { %v652_v45 = vpop.f32.mrb[0].mxu0 }
 0x439   : > { %v1350_v46 = vpop.f32.mrb[1].mxu0  ;;  %v739_v47 = vsel %vm732_vm3, %v652_v45, -inf }
 0x43a   : > { %740 = vmax.xlane.f32.xlu1 %v739_v47 }
 0x43c   : > { %v728_v48 = vpop.f32.mrb[6].mxu1 }
 0x43d   : > { %v1355_v49 = vpop.f32.mrb[7].mxu1  ;;  %v742_v50 = vsel %vm732_vm3, %v728_v48, -inf }
 0x43e   : > { %743 = vmax.xlane.f32.xlu0 %v742_v50 }
 0x44b   : > { %424 = vrot.lane.b32.xlu1 %v407_v30, %s1681_s18 }
 0x454   : > { %421 = vrot.lane.b32.xlu0 %v407_v30, %s1683_s14  ;;  %s1176_s14 = scalar_lea.sflag [#allocation4], %s1894_s20 }
 0x458   : > { %v735_v51 = vpop.xlane.xlu1 %734 }
 0x459   : > { %v745_v52 = vsub.f32 %v500_v39, %v735_v51 }
 0x45b   : > { %v749_v53 = vmul.f32 1.442695, %v745_v52 }
 0x45d   : > { %1498 = vpow2.f32 %v749_v53 }
 0x467   : > { %v1499_v54 = vpop.eup %1498 }
 0x468   : > { %1359 = vmatmul.mubr.msk.f32.vlgmr.msra.gmra.mrb[2].mxu0 %vm732_vm3, %v1499_v54  ;;  %v757_v5 = vsel %vm732_vm3, %v1499_v54, 0.0 }
 0x469   : > { %1368 = vmatprep.mubr.msk.f32.mxu0 %vm1680_vm1, %v1679_v14 }
 0x4c3   : > { %v738_v55 = vpop.xlane.xlu0 %737 }
 0x4c4   : > { %v746_v56 = vsub.f32 %v576_v42, %v738_v55 }
 0x4c6   : > { %v751_v57 = vmul.f32 1.442695, %v746_v56 }
 0x4c7   : > { %v741_v58 = vpop.xlane.xlu1 %740 }
 0x4c8   : > { %1500 = vpow2.f32 %v751_v57  ;;  %v747_v59 = vsub.f32 %v652_v45, %v741_v58 }
 0x4ca   : > { %v753_v60 = vmul.f32 1.442695, %v747_v59 }
 0x4cb   : > { %v744_v61 = vpop.xlane.xlu0 %743  ;;  %v425_v2 = vpop.permute.xlu1 %424 }
 0x4cc   : > { %1502 = vpow2.f32 %v753_v60  ;;  %v748_v62 = vsub.f32 %v728_v48, %v744_v61  ;;  %v1305_v48 = vld [vmem:[%s2028_s5] ss:$0 sm:$0xff] }
 0x4ce   : > { %v755_v63 = vmul.f32 1.442695, %v748_v62 }
 0x4cf   : > { %v422_v0 = vpop.permute.xlu0 %421 }
 0x4d0   : > { %1504 = vpow2.f32 %v755_v63  ;;  %1367 = vmatpush3.msra.mxu0 %v422_v0 }
 0x4d1   : > { %1403 = vmatprep.subr.bf16.mxu0 %v1685_v12 }
 0x4d2   : > { %v1501_v1 = vpop.eup %1500 }
 0x4d3   : > { %1364 = vmatmul.mubr.msk.f32.vlgmr.msra.gmra.mrb[8].mxu1 %vm732_vm3, %v1501_v1  ;;  %v760_v3 = vsel %vm732_vm3, %v1501_v1, 0.0 }
 0x4d4   : > { %1372 = vmatpush3.msra.mxu1 %v425_v2  ;;  %761 = vadd.xlane.f32.xlu1 %v760_v3 }
 0x4d5   : > { %1373 = vmatprep.mubr.msk.f32.mxu1 %vm1680_vm1, %v1679_v14 }
 0x4d6   : > { %v1503_v4 = vpop.eup %1502 }
 0x4d7   : > { %1369 = vmatmul.mubr.msk.f32.vlgmr.msra.gmra.mrb[4].mxu0 %vm732_vm3, %v1503_v4  ;;  %v763_v6 = vsel %vm732_vm3, %v1503_v4, 0.0 }
 0x4d8   : > { %758 = vadd.xlane.f32.xlu1 %v757_v5  ;;  %764 = vadd.xlane.f32.xlu0 %v763_v6 }
 0x4d9   : > { %1392 = vmatprep.mubr.msk.f32.mxu0 %vm1680_vm1, %v1679_v14  ;;  %1405 = vmatpush3.bf16.msra.mxu0 %v1404_v13 }
 0x4da   : > { %v1505_v7 = vpop.eup %1504  ;;  %1406 = vmatprep.subr.bf16.mxu0 %v1685_v12 }
 0x4db   : > { %1374 = vmatmul.mubr.msk.f32.vlgmr.msra.gmra.mrb[10].mxu1 %vm732_vm3, %v1505_v7  ;;  %v766_v8 = vsel %vm732_vm3, %v1505_v7, 0.0 }
 0x4dc   : > { %767 = vadd.xlane.f32.xlu0 %v766_v8 }
 0x4dd   : > { %1408 = vmatpush3.bf16.msra.mxu0 %v1407_v16 }
 0x4de   : > { %1409 = vmatprep.subr.bf16.mxu0 %v1685_v12 }
 0x4e1   : > { %1411 = vmatpush3.bf16.msra.mxu0 %v1410_v22 }
 0x4e2   : > { %1412 = vmatprep.subr.bf16.mxu0 %v1685_v12 }
 0x4e5   : > { %1414 = vmatpush3.bf16.msra.mxu0 %v1413_v26 }
 0x53b   : > { %v838_v17 = vpop.f32.mrb[2].mxu0 }
 0x53c   : > { %v1360_v14 = vpop.f32.mrb[3].mxu0 }
 0x561   : > { %v762_v18 = vpop.xlane.xlu1 %761 }
 0x562   : > { %1506 = vrcp.f32 %v762_v18 }
 0x565   : > { %v765_v19 = vpop.xlane.xlu0 %764  ;;  %v759_v39 = vpop.xlane.xlu1 %758 }
 0x566   : > { %1508 = vrcp.f32 %v765_v19 }
 0x569   : > { %v768_v25 = vpop.xlane.xlu0 %767 }
 0x56a   : > { %1510 = vrcp.f32 %v768_v25 }
 0x56b   : > { %1512 = vrcp.f32 %v759_v39 }
 0x56c   : > { %v1507_v27 = vpop.eup %1506 }
 0x570   : > { %v1509_v31 = vpop.eup %1508 }
 0x574   : > { %v1511_v35 = vpop.eup %1510 }
 0x575   : > { %v1513_v40 = vpop.eup %1512 }
 0x576   : > { %v1065_v43 = vmul.f32 %v1513_v40, %v838_v17 }
 0x5a6   : > { %v911_v28 = vpop.f32.mrb[8].mxu1 }
 0x5a7   : > { %v1066_v29 = vmul.f32 %v1507_v27, %v911_v28  ;;  %v1365_v30 = vpop.f32.mrb[9].mxu1 }
 0x5a9   : > { %1070 = vrot.lane.b32.xlu0 %v1066_v29, %s1686_s15  ;;  %s1606_s15 = scalar_lea.vmem %s1605_s9, 256 }
 0x5aa   : > { %v984_v32 = vpop.f32.mrb[4].mxu0  ;;  %p1608_p9 = scmp.lt.s32.totalorder %s1606_s15, %s1600_s8 }
 0x5ab   : > { %v1067_v33 = vmul.f32 %v1509_v31, %v984_v32  ;;  %v1370_v34 = vpop.f32.mrb[5].mxu0 }
 0x5ac   : > { %p1609_p12 = por %p1608_p9, %p1607_p5 }
 0x5ad   : > { %1074 = vrot.lane.b32.xlu1 %v1067_v33, %s1687_s7 }
 0x5ae   : > { %v1057_v36 = vpop.f32.mrb[10].mxu1  ;;  %p1610_p2 = pnand %p1609_p12, %p1603_p3 }
 0x5af   : > { %v1068_v37 = vmul.f32 %v1511_v35, %v1057_v36  ;;  %v1375_v38 = vpop.f32.mrb[11].mxu1 }
 0x5b1   : > { %1078 = vrot.lane.b32.xlu1 %v1068_v37, %s1688_s30 }
 0x61b   : > { %v1071_v41 = vpop.permute.xlu0 %1070 }
 0x61c   : > { %v1081_v44 = vsel %vm429_vm2, %v1065_v43, %v1071_v41 }
 0x61f   : > { %v1075_v42 = vpop.permute.xlu1 %1074 }
 0x620   : > { %v1082_v45 = vsel %vm297_vm0, %v1081_v44, %v1075_v42 }
 0x623   : > { %v1079_v46 = vpop.permute.xlu1 %1078 }
 0x624   : > { %v1084_v47 = vsel %vm1083_vm4, %v1082_v45, %v1079_v46 }
 0x625   : > { %1393 = vmatmul.mubr.msk.f32.vlgmr.msra.gmra.mrb[6].mxu0 %vm1100_vm5, %v1084_v47 }
 0x6f8   : > { %v1170_v49 = vpop.f32.mrb[6].mxu0 }
 0x6f9   : > { %v1171_v50 = vadd.f32 %v1305_v48, %v1170_v49  ;;  %v1394_v51 = vpop.f32.mrb[7].mxu0 }
 0x6fb   : > { %1174 = vst [vmem:[%s295_s29] sm:$0xff] %v1171_v50 }
 0x6fc   : > { %1613 = shalt.err (!%p1610_p2)
}
 0x6fd   : > { %s1614_s20 = scalar_lea.hbm %s1979_s19, 128  ;;  %s1618_s13 = scalar_lea.hbm %s2029_s6, 256 }
 0x6fe   : > { %p1615_p13 = scmp.ne.s32.totalorder %s1979_s19, %s1614_s20  ;;  %p1619_p4 = scmp.lt.u32.totalorder %s1979_s19, %s2029_s6 }
 0x6ff   : > { %p1620_p7 = scmp.lt.u32.totalorder %s1618_s13, %s1614_s20  ;;  %p1622_p11 = scmp.lt.u32.totalorder %s1614_s20, %s1979_s19 }
 0x700   : > { %p1616_p6 = pnand %p1615_p13, %p2043_p0 }
 0x701   : > { %p1621_p8 = por %p1620_p7, %p1619_p4 }
 0x702   : > { %p1617_p10 = pneg %p1616_p6 }
 0x703   : > { %p1623_p1 = por %p1622_p11, %p1621_p8 }
 0x705   : > { %p1624_p3 = pnand %p1623_p1, %p1617_p10 }
 0x707   : > { %1627 = shalt.err (!%p1624_p3)
}
 0x708   : > { %1425 = dma.vmem_to_hbm [thread:$0]  (%p2043_p0), %s1981_s16, 128, %s1979_s19, %s1176_s14  }
 0x709 PF: > { %s1201_s29 = sand.u32 1, %s1658_s21   ;;  %p2044_p5 = scmp.ne.s32.totalorder %s2034_s28, 0 }
 0x70a   : > { %p2045_p9 = scmp.ge.s32.totalorder %s1670_s24, 2  ;;  %s1202_s17 = scalar_lea.sflag [#allocation4], %s1201_s29 }
 0x70c   : > { %p1439_p12 = pnand %p2045_p9, %p2044_p5 }
 0x70e   : > { %1653 = dma.done.wait (!%p1439_p12), %s1202_s17, 128  }
 0x70f   : > { %1655 = vsyncadd (!%p1439_p12), %s1202_s17, 4294967168  ;;  %p20_p2 = scmp.ge.s32.totalorder %s1835_s26, 4   ;;  %s2046_s21 = smov %s1662_s22 }
 0x710   : > { %s2047_s22 = smov %s1666_s23  ;;  %s2048_s23 = smov %s1844_s11 }
 0x711   : > { %s2049_s24 = smov %s1835_s26  ;;  %22 = sbr.rel (!%p20_p2) target bundleno = 6 (0x6), region = 97 }
 0x718   :  { %1207 = vsyncpa [#allocation3], 1 }
 0x719   :  { %1209 = vsyncpa [#allocation3 + $0x1], 1 }
 0x71a   :  { %1210 = vsyncpa [#allocation6], 1 }
 0x71b   :  { %1211 = vsyncpa [#allocation4], 1 }
 0x71c   :  { %1213 = vsyncpa [#allocation4 + $0x1], 1 }

</bundles_post_ra>
